<compile_context>
chip_gen: v6e
topology: v6e:2x2x1
jax: 0.10.0
libtpu: 0.0.40
codegen_flags: <defaults>
</compile_context>

<pallas_src>
import numpy as np
import jax
import jax.numpy as jnp
from jax import lax
from jax.experimental import pallas as pl
from jax.experimental.pallas import tpu as pltpu
from functools import partial

# ---------------------------------------------------------------------------
# Module-level constants (defined elsewhere in the original file; chosen here)
# ---------------------------------------------------------------------------
IN_PREV_IDX = 0          # column of x_tasks flagging "task was in previous window"
TASK_FEAT_IDX = 1        # column of x_tasks holding the per-graph machine assignment
INPUT_TASK_DIM = 8
INPUT_MACHINE_DIM = 6
HIDDEN_DIM = 32
OUTPUT_DIM = 1
BN_EPS = 1e-5

_VMEM = pl.BlockSpec(memory_space=pltpu.MemorySpace.VMEM)


# ---------------------------------------------------------------------------
# Single fused Pallas kernel: the whole forward pass, VMEM-resident.
# ---------------------------------------------------------------------------
def _fused_forward_kernel(
        num_graphs,
        # data / index vectors
        x_t_ref, x_m_ref, tb_row_ref, mb_row_ref, tm_col_ref, prev_col_ref,
        # tasks_embedding (BN folded to scale/shift, then 2-layer MLP + ReLU)
        ts_ref, tt_ref, tw1_ref, tb1_ref, tw2_ref, tb2_ref,
        # machines_embedding
        ms_ref, mt_ref, mw1_ref, mb1_ref, mw2_ref, mb2_ref,
        # aggr_layers (unsplit [2H,H] first layer)
        aw1_ref, ab1_ref, aw2_ref, ab2_ref,
        # local_global_aggr_layers (unsplit [3H,H] first layer)
        lw1_ref, lb1_ref, lw2_ref, lb2_ref,
        # output_layers
        ow1_ref, ob1_ref, ow2_ref, ob2_ref,
        # output
        out_ref):
    G = num_graphs
    N_T = x_t_ref.shape[0]
    N_M = x_m_ref.shape[0]
    P = out_ref.shape[0]
    f32 = jnp.float32
    bf16 = jnp.bfloat16

    def mm(a, w):
        # single-pass bf16 MXU matmul, f32 accumulation (weights already bf16)
        return jnp.dot(a.astype(bf16), w, preferred_element_type=f32)

    # ---- tasks embedding: BN(eval) -> Linear -> ReLU -> Linear -> ReLU ----
    xt = x_t_ref[...] * ts_ref[...] + tt_ref[...]
    h = jnp.maximum(mm(xt, tw1_ref[...]) + tb1_ref[...], 0.0)
    task_h = jnp.maximum(mm(h, tw2_ref[...]) + tb2_ref[...], 0.0)

    # ---- machines embedding ----
    xm = x_m_ref[...] * ms_ref[...] + mt_ref[...]
    h = jnp.maximum(mm(xm, mw1_ref[...]) + mb1_ref[...], 0.0)
    mach_h = jnp.maximum(mm(h, mw2_ref[...]) + mb2_ref[...], 0.0)

    task_h_b = task_h.astype(bf16)
    mach_h_b = mach_h.astype(bf16)

    # ---- scatter_mean per graph: one-hot masks built in-kernel, cast bf16 ----
    iota_gt = lax.broadcasted_iota(jnp.int32, (G, N_T), 0)
    onehot_t_f = jnp.where(iota_gt == tb_row_ref[...], 1.0, 0.0)          # [G, N_T] f32
    iota_gm = lax.broadcasted_iota(jnp.int32, (G, N_M), 0)
    onehot_m_f = jnp.where(iota_gm == mb_row_ref[...], 1.0, 0.0)          # [G, N_M] f32
    inv_t = 1.0 / jnp.maximum(jnp.sum(onehot_t_f, axis=1, keepdims=True), 1.0)
    inv_m = 1.0 / jnp.maximum(jnp.sum(onehot_m_f, axis=1, keepdims=True), 1.0)
    task_mean = jnp.dot(onehot_t_f.astype(bf16), task_h_b,
                        preferred_element_type=f32) * inv_t               # [G, H]
    mach_mean = jnp.dot(onehot_m_f.astype(bf16), mach_h_b,
                        preferred_element_type=f32) * inv_m               # [G, H]

    # ---- aggr_layers: single K=2H matmul on the lane-concatenated means ----
    aggr_in = jnp.concatenate([task_mean, mach_mean], axis=-1)            # [G, 2H]
    ah = jnp.maximum(mm(aggr_in, aw1_ref[...]) + ab1_ref[...], 0.0)
    aggr_embed = mm(ah, aw2_ref[...]) + ab2_ref[...]                      # [G, H]

    # ---- expand aggr_embed to per-task rows: reuse onehot_t via transpose ----
    expand_t = onehot_t_f.T.astype(bf16)                                  # [N_T, G]
    aggr_exp = jnp.dot(expand_t, aggr_embed.astype(bf16),
                       preferred_element_type=f32)                        # [N_T, H]

    # ---- assigned-machine gather; sentinel (task_m == N_M) -> zero row ----
    iota_tm = lax.broadcasted_iota(jnp.int32, (N_T, N_M), 1)
    sel_m = jnp.where(iota_tm == tm_col_ref[...], 1.0, 0.0).astype(bf16)  # [N_T, N_M]
    t_m_embed = jnp.dot(sel_m, mach_h_b, preferred_element_type=f32)      # [N_T, H]

    # ---- local_global_aggr_layers: single K=3H matmul on the concat ----
    lg_in = jnp.concatenate([task_h, aggr_exp, t_m_embed], axis=-1)       # [N_T, 3H]
    lh = jnp.maximum(mm(lg_in, lw1_ref[...]) + lb1_ref[...], 0.0)
    task_h2 = mm(lh, lw2_ref[...]) + lb2_ref[...]                         # [N_T, H]

    # ---- select prev-task rows BEFORE the output head ----
    iota_pt = lax.broadcasted_iota(jnp.int32, (P, N_T), 1)
    sel_p = jnp.where(iota_pt == prev_col_ref[...], 1.0, 0.0).astype(bf16)  # [P, N_T]
    prev_h = jnp.dot(sel_p, task_h2.astype(bf16), preferred_element_type=f32)  # [P, H]

    # ---- output head on only P rows ----
    oh = jnp.maximum(mm(prev_h, ow1_ref[...]) + ob1_ref[...], 0.0)
    out_ref[...] = mm(oh, ow2_ref[...]) + ob2_ref[...]                    # [P, 1]


# ---------------------------------------------------------------------------
# Host-side index glue (get_separate_tasks / tasks_select_assignment)
# ---------------------------------------------------------------------------
def get_separate_tasks_np(x_tasks, task_label_idx):
    prev_tasks = x_tasks[:, IN_PREV_IDX] == 1
    prev_idx = np.nonzero(prev_tasks)[0]
    prev_dict = {int(g): i for i, g in enumerate(prev_idx)}
    prev_tasks_label_idx = np.array(
        [prev_dict[int(t)] for t in task_label_idx if prev_tasks[t]], dtype=np.int32)
    return prev_tasks_label_idx


def tasks_select_assignment_np(x_tasks, x_tasks_batch, x_machines_batch, num_graphs, num_machines):
    task_m = x_tasks[:, TASK_FEAT_IDX].copy()
    counts = np.bincount(x_machines_batch, minlength=num_graphs)
    cum = np.cumsum(counts) - counts
    task_m = task_m + cum[x_tasks_batch]
    task_m[x_tasks[:, TASK_FEAT_IDX] == -1] = num_machines
    return task_m.astype(np.int32)


# ---------------------------------------------------------------------------
# VMEM-footprint / cost helpers
# ---------------------------------------------------------------------------
def _pad128(n):
    return ((max(int(n), 1) + 127) // 128) * 128


def _estimate_vmem_limit_bytes(n_t, n_m, g, n_p):
    H = HIDDEN_DIM
    b = 0
    # f32 activations (lane padded)
    b += 4 * n_t * (_pad128(INPUT_TASK_DIM) + 3 * _pad128(H) + _pad128(3 * H))
    b += 4 * n_m * (_pad128(INPUT_MACHINE_DIM) + 2 * _pad128(H))
    b += 4 * g * (3 * _pad128(H) + _pad128(2 * H))
    b += 4 * n_p * 2 * _pad128(H)
    # bf16 masks + bf16 activation casts
    b += 2 * (g * (_pad128(n_t) + _pad128(n_m))
              + n_t * (_pad128(g) + _pad128(n_m) + _pad128(3 * H))
              + n_p * _pad128(n_t))
    # weights / biases / index vectors / misc
    b += 1 << 20
    # headroom for compiler temporaries & relayouts
    b *= 2
    return int(min(max(b, 32 * 1024 * 1024), 48 * 1024 * 1024))


def _estimate_flops(n_t, n_m, g, n_p):
    H = HIDDEN_DIM
    return int(2 * (
        n_t * (INPUT_TASK_DIM * H + H * H)
        + n_m * (INPUT_MACHINE_DIM * H + H * H)
        + g * H * (n_t + n_m)
        + g * (2 * H * H + H * H)
        + n_t * g * H
        + n_t * n_m * H
        + n_t * (3 * H * H + H * H)
        + n_p * n_t * H
        + n_p * (H * H + H * OUTPUT_DIM)))


# ---------------------------------------------------------------------------
# Forward pass wrapper: one pallas_call, BN folded / weights bf16-cast outside.
# ---------------------------------------------------------------------------
@partial(jax.jit, static_argnames=("num_graphs",))
def flexible_jss_forward(p, x_tasks, x_machines, x_tasks_batch, x_machines_batch,
                         task_m, prev_tasks_label_idx, num_graphs):
    n_t = x_tasks.shape[0]
    n_m = x_machines.shape[0]
    n_p = prev_tasks_label_idx.shape[0]
    if n_p == 0:  # zero-sized output block would not lower; nothing to compute
        return jnp.zeros((0, OUTPUT_DIM), jnp.float32)

    bf16 = jnp.bfloat16

    # fold BatchNorm (eval mode) into per-feature scale/shift (f32)
    s_t = p["bn_t_gamma"] / jnp.sqrt(p["bn_t_var"] + BN_EPS)
    t_t = p["bn_t_beta"] - p["bn_t_mean"] * s_t
    s_m = p["bn_m_gamma"] / jnp.sqrt(p["bn_m_var"] + BN_EPS)
    t_m_shift = p["bn_m_beta"] - p["bn_m_mean"] * s_m

    # index vectors (lane-major rows where the kernel consumes them as rows)
    tb_row = x_tasks_batch.astype(jnp.int32).reshape(1, n_t)
    mb_row = x_machines_batch.astype(jnp.int32).reshape(1, n_m)
    tm_col = task_m.astype(jnp.int32).reshape(n_t, 1)
    prev_col = prev_tasks_label_idx.astype(jnp.int32).reshape(n_p, 1)

    w = lambda a: a.astype(bf16)          # weights -> bf16 (single-pass MXU)
    r = lambda a: a.reshape(1, -1)        # biases / BN vectors stay f32 rows

    args = (
        # data
        x_tasks.astype(jnp.float32), x_machines.astype(jnp.float32),
        tb_row, mb_row, tm_col, prev_col,
        # tasks embedding
        r(s_t), r(t_t), w(p["t_w1"]), r(p["t_b1"]), w(p["t_w2"]), r(p["t_b2"]),
        # machines embedding
        r(s_m), r(t_m_shift), w(p["m_w1"]), r(p["m_b1"]), w(p["m_w2"]), r(p["m_b2"]),
        # aggr layers (unsplit first layer)
        w(p["a_w1"]), r(p["a_b1"]), w(p["a_w2"]), r(p["a_b2"]),
        # local/global layers (unsplit first layer)
        w(p["lg_w1"]), r(p["lg_b1"]), w(p["lg_w2"]), r(p["lg_b2"]),
        # output head
        w(p["o_w1"]), r(p["o_b1"]), w(p["o_w2"]), r(p["o_b2"]),
    )

    bytes_accessed = int(sum(int(np.prod(a.shape)) * np.dtype(a.dtype).itemsize for a in args)
                         + n_p * OUTPUT_DIM * 4)
    flops = _estimate_flops(n_t, n_m, num_graphs, n_p)

    return pl.pallas_call(
        partial(_fused_forward_kernel, num_graphs),
        out_shape=jax.ShapeDtypeStruct((n_p, OUTPUT_DIM), jnp.float32),
        in_specs=[_VMEM] * len(args),
        out_specs=_VMEM,
        compiler_params=pltpu.CompilerParams(
            vmem_limit_bytes=_estimate_vmem_limit_bytes(n_t, n_m, num_graphs, n_p)),
        cost_estimate=pl.CostEstimate(
            flops=flops, transcendentals=0, bytes_accessed=bytes_accessed),
    )(*args)


# ---------------------------------------------------------------------------
# Pure-JAX reference (same math, f32, no Pallas) for a correctness check
# ---------------------------------------------------------------------------
def reference_forward(p, x_tasks, x_machines, x_tasks_batch, x_machines_batch,
                      task_m, prev_tasks_label_idx, num_graphs):
    H = HIDDEN_DIM

    def bn(x, gamma, beta, mean, var):
        return (x - mean) / jnp.sqrt(var + BN_EPS) * gamma + beta

    def mlp2_relu(x, w1, b1, w2, b2):
        h = jnp.maximum(x @ w1 + b1, 0.0)
        return jnp.maximum(h @ w2 + b2, 0.0)

    def mlp2_plain(x, w1, b1, w2, b2):
        h = jnp.maximum(x @ w1 + b1, 0.0)
        return h @ w2 + b2

    task_h = mlp2_relu(bn(x_tasks, p["bn_t_gamma"], p["bn_t_beta"], p["bn_t_mean"], p["bn_t_var"]),
                       p["t_w1"], p["t_b1"], p["t_w2"], p["t_b2"])
    mach_h = mlp2_relu(bn(x_machines, p["bn_m_gamma"], p["bn_m_beta"], p["bn_m_mean"], p["bn_m_var"]),
                       p["m_w1"], p["m_b1"], p["m_w2"], p["m_b2"])

    def seg_mean(x, batch):
        s = jax.ops.segment_sum(x, batch, num_segments=num_graphs)
        c = jax.ops.segment_sum(jnp.ones((x.shape[0],), jnp.float32), batch, num_segments=num_graphs)
        return s / jnp.clip(c, 1.0, None)[:, None]

    aggr_cat = jnp.concatenate([seg_mean(task_h, x_tasks_batch),
                                seg_mean(mach_h, x_machines_batch)], axis=1)
    aggr_embed = mlp2_plain(aggr_cat, p["a_w1"], p["a_b1"], p["a_w2"], p["a_b2"])
    aggr_exp = aggr_embed[x_tasks_batch]
    mach_cat = jnp.concatenate([mach_h, jnp.zeros((1, H), jnp.float32)], axis=0)
    t_m_embed = mach_cat[task_m]
    task_cat = jnp.concatenate([task_h, aggr_exp, t_m_embed], axis=1)
    task_h2 = mlp2_plain(task_cat, p["lg_w1"], p["lg_b1"], p["lg_w2"], p["lg_b2"])
    out_all = mlp2_plain(task_h2, p["o_w1"], p["o_b1"], p["o_w2"], p["o_b2"])
    return out_all[prev_tasks_label_idx]


# ---------------------------------------------------------------------------
# Deterministic parameter init (shapes follow FlexibleJSSNet.__init__)
# ---------------------------------------------------------------------------
def _linear(key, fan_in, fan_out):
    kw, kb = jax.random.split(key)
    w = 0.1 * jax.random.normal(kw, (fan_in, fan_out), jnp.float32)
    b = 0.1 * jax.random.normal(kb, (fan_out,), jnp.float32)
    return w, b


def _bn_params(key, dim):
    k1, k2, k3, k4 = jax.random.split(key, 4)
    gamma = 1.0 + 0.1 * jax.random.normal(k1, (dim,), jnp.float32)
    beta = 0.1 * jax.random.normal(k2, (dim,), jnp.float32)
    mean = 0.1 * jax.random.normal(k3, (dim,), jnp.float32)
    var = 0.5 + jnp.abs(jax.random.normal(k4, (dim,), jnp.float32))
    return gamma, beta, mean, var


def make_params(key):
    H = HIDDEN_DIM
    ks = jax.random.split(key, 12)
    p = {}
    p["bn_t_gamma"], p["bn_t_beta"], p["bn_t_mean"], p["bn_t_var"] = _bn_params(ks[0], INPUT_TASK_DIM)
    p["t_w1"], p["t_b1"] = _linear(ks[1], INPUT_TASK_DIM, H)
    p["t_w2"], p["t_b2"] = _linear(ks[2], H, H)
    p["bn_m_gamma"], p["bn_m_beta"], p["bn_m_mean"], p["bn_m_var"] = _bn_params(ks[3], INPUT_MACHINE_DIM)
    p["m_w1"], p["m_b1"] = _linear(ks[4], INPUT_MACHINE_DIM, H)
    p["m_w2"], p["m_b2"] = _linear(ks[5], H, H)
    p["a_w1"], p["a_b1"] = _linear(ks[6], 2 * H, H)
    p["a_w2"], p["a_b2"] = _linear(ks[7], H, H)
    p["lg_w1"], p["lg_b1"] = _linear(ks[8], 3 * H, H)
    p["lg_w2"], p["lg_b2"] = _linear(ks[9], H, H)
    p["o_w1"], p["o_b1"] = _linear(ks[10], H, H)
    p["o_w2"], p["o_b2"] = _linear(ks[11], H, OUTPUT_DIM)
    return p


# ---------------------------------------------------------------------------
if __name__ == "__main__":
    key = jax.random.PRNGKey(0)
    key, kp, kt, km = jax.random.split(key, 4)

    num_graphs = 2
    N_T, N_M = 12, 6
    x_tasks_batch = np.array([0] * 6 + [1] * 6, dtype=np.int32)
    x_machines_batch = np.array([0] * 3 + [1] * 3, dtype=np.int32)

    # np.array(...) makes a WRITABLE host copy (np.asarray of a jax array is read-only)
    x_tasks = np.array(jax.random.normal(kt, (N_T, INPUT_TASK_DIM), jnp.float32))
    x_machines = np.array(jax.random.normal(km, (N_M, INPUT_MACHINE_DIM), jnp.float32))
    # feature columns consumed by the index glue
    x_tasks[:, IN_PREV_IDX] = np.array([1, 0, 1, 1, 0, 1, 1, 1, 0, 1, 0, 1], dtype=np.float32)
    x_tasks[:, TASK_FEAT_IDX] = np.array([0, 1, 2, -1, 0, 1, 2, 0, -1, 1, 2, 0], dtype=np.float32)
    task_label_idx = np.array([0, 2, 4, 6, 9, 11], dtype=np.int64)

    prev_tasks_label_idx = get_separate_tasks_np(x_tasks, task_label_idx)
    task_m = tasks_select_assignment_np(x_tasks, x_tasks_batch, x_machines_batch,
                                        num_graphs, N_M)

    params = make_params(kp)

    args = (params,
            jnp.asarray(x_tasks), jnp.asarray(x_machines),
            jnp.asarray(x_tasks_batch), jnp.asarray(x_machines_batch),
            jnp.asarray(task_m), jnp.asarray(prev_tasks_label_idx))

    out = flexible_jss_forward(*args, num_graphs=num_graphs)
    jax.block_until_ready(out)

    ref = reference_forward(*args, num_graphs=num_graphs)
    # bf16 MXU path in the kernel (vs f32 reference) -> relaxed tolerance
    np.testing.assert_allclose(np.asarray(out), np.asarray(ref), rtol=5e-2, atol=3e-2)
    assert out.shape == (len(prev_tasks_label_idx), OUTPUT_DIM)
    print("KERNEL_OK")
</pallas_src>

<mosaic_0001>
module attributes {stable_mosaic.version = 11 : i64} {
  func.func @_fused_forward_kernel(%arg0: memref<12x8xf32, #tpu.memory_space<vmem>>, %arg1: memref<6x6xf32, #tpu.memory_space<vmem>>, %arg2: memref<1x12xi32, #tpu.memory_space<vmem>>, %arg3: memref<1x6xi32, #tpu.memory_space<vmem>>, %arg4: memref<12x1xi32, #tpu.memory_space<vmem>>, %arg5: memref<5x1xi32, #tpu.memory_space<vmem>>, %arg6: memref<1x8xf32, #tpu.memory_space<vmem>>, %arg7: memref<1x8xf32, #tpu.memory_space<vmem>>, %arg8: memref<8x32xbf16, #tpu.memory_space<vmem>>, %arg9: memref<1x32xf32, #tpu.memory_space<vmem>>, %arg10: memref<32x32xbf16, #tpu.memory_space<vmem>>, %arg11: memref<1x32xf32, #tpu.memory_space<vmem>>, %arg12: memref<1x6xf32, #tpu.memory_space<vmem>>, %arg13: memref<1x6xf32, #tpu.memory_space<vmem>>, %arg14: memref<6x32xbf16, #tpu.memory_space<vmem>>, %arg15: memref<1x32xf32, #tpu.memory_space<vmem>>, %arg16: memref<32x32xbf16, #tpu.memory_space<vmem>>, %arg17: memref<1x32xf32, #tpu.memory_space<vmem>>, %arg18: memref<64x32xbf16, #tpu.memory_space<vmem>>, %arg19: memref<1x32xf32, #tpu.memory_space<vmem>>, %arg20: memref<32x32xbf16, #tpu.memory_space<vmem>>, %arg21: memref<1x32xf32, #tpu.memory_space<vmem>>, %arg22: memref<96x32xbf16, #tpu.memory_space<vmem>>, %arg23: memref<1x32xf32, #tpu.memory_space<vmem>>, %arg24: memref<32x32xbf16, #tpu.memory_space<vmem>>, %arg25: memref<1x32xf32, #tpu.memory_space<vmem>>, %arg26: memref<32x32xbf16, #tpu.memory_space<vmem>>, %arg27: memref<1x32xf32, #tpu.memory_space<vmem>>, %arg28: memref<32x1xbf16, #tpu.memory_space<vmem>>, %arg29: memref<1x1xf32, #tpu.memory_space<vmem>>, %arg30: memref<5x1xf32, #tpu.memory_space<vmem>>) attributes {dimension_semantics = [], scalar_prefetch = 0 : i64, scratch_operands = 0 : i64, tpu.core_type = #tpu.core_type<tc>} {
    %c0 = arith.constant 0 : index
    %c0_0 = arith.constant 0 : index
    %0 = vector.load %arg0[%c0, %c0_0] : memref<12x8xf32, #tpu.memory_space<vmem>>, vector<12x8xf32>
    %c0_1 = arith.constant 0 : index
    %c0_2 = arith.constant 0 : index
    %1 = vector.load %arg6[%c0_1, %c0_2] : memref<1x8xf32, #tpu.memory_space<vmem>>, vector<1x8xf32>
    %2 = vector.broadcast %1 : vector<1x8xf32> to vector<12x8xf32>
    %3 = arith.mulf %0, %2 : vector<12x8xf32>
    %c0_3 = arith.constant 0 : index
    %c0_4 = arith.constant 0 : index
    %4 = vector.load %arg7[%c0_3, %c0_4] : memref<1x8xf32, #tpu.memory_space<vmem>>, vector<1x8xf32>
    %5 = vector.broadcast %4 : vector<1x8xf32> to vector<12x8xf32>
    %6 = arith.addf %3, %5 : vector<12x8xf32>
    %c0_5 = arith.constant 0 : index
    %c0_6 = arith.constant 0 : index
    %7 = vector.load %arg8[%c0_5, %c0_6] : memref<8x32xbf16, #tpu.memory_space<vmem>>, vector<8x32xbf16>
    %8 = arith.truncf %6 : vector<12x8xf32> to vector<12x8xbf16>
    %cst = arith.constant dense<0.000000e+00> : vector<12x32xf32>
    %9 = tpu.matmul %8, %7, %cst {dimension_numbers = #tpu.dot_dimension_numbers<[1], [0], [0], [1], [0, 0, 1, 1], [], []>} : vector<12x8xbf16>, vector<8x32xbf16>, vector<12x32xf32> -> vector<12x32xf32>
    %c0_7 = arith.constant 0 : index
    %c0_8 = arith.constant 0 : index
    %10 = vector.load %arg9[%c0_7, %c0_8] : memref<1x32xf32, #tpu.memory_space<vmem>>, vector<1x32xf32>
    %11 = vector.broadcast %10 : vector<1x32xf32> to vector<12x32xf32>
    %12 = arith.addf %9, %11 : vector<12x32xf32>
    %cst_9 = arith.constant 0.000000e+00 : f32
    %13 = vector.broadcast %cst_9 : f32 to vector<12x32xf32>
    %14 = arith.maximumf %12, %13 : vector<12x32xf32>
    %c0_10 = arith.constant 0 : index
    %c0_11 = arith.constant 0 : index
    %15 = vector.load %arg10[%c0_10, %c0_11] : memref<32x32xbf16, #tpu.memory_space<vmem>>, vector<32x32xbf16>
    %16 = arith.truncf %14 : vector<12x32xf32> to vector<12x32xbf16>
    %cst_12 = arith.constant dense<0.000000e+00> : vector<12x32xf32>
    %17 = tpu.matmul %16, %15, %cst_12 {dimension_numbers = #tpu.dot_dimension_numbers<[1], [0], [0], [1], [0, 0, 1, 1], [], []>} : vector<12x32xbf16>, vector<32x32xbf16>, vector<12x32xf32> -> vector<12x32xf32>
    %c0_13 = arith.constant 0 : index
    %c0_14 = arith.constant 0 : index
    %18 = vector.load %arg11[%c0_13, %c0_14] : memref<1x32xf32, #tpu.memory_space<vmem>>, vector<1x32xf32>
    %19 = vector.broadcast %18 : vector<1x32xf32> to vector<12x32xf32>
    %20 = arith.addf %17, %19 : vector<12x32xf32>
    %cst_15 = arith.constant 0.000000e+00 : f32
    %21 = vector.broadcast %cst_15 : f32 to vector<12x32xf32>
    %22 = arith.maximumf %20, %21 : vector<12x32xf32>
    %c0_16 = arith.constant 0 : index
    %c0_17 = arith.constant 0 : index
    %23 = vector.load %arg1[%c0_16, %c0_17] : memref<6x6xf32, #tpu.memory_space<vmem>>, vector<6x6xf32>
    %c0_18 = arith.constant 0 : index
    %c0_19 = arith.constant 0 : index
    %24 = vector.load %arg12[%c0_18, %c0_19] : memref<1x6xf32, #tpu.memory_space<vmem>>, vector<1x6xf32>
    %25 = vector.broadcast %24 : vector<1x6xf32> to vector<6x6xf32>
    %26 = arith.mulf %23, %25 : vector<6x6xf32>
    %c0_20 = arith.constant 0 : index
    %c0_21 = arith.constant 0 : index
    %27 = vector.load %arg13[%c0_20, %c0_21] : memref<1x6xf32, #tpu.memory_space<vmem>>, vector<1x6xf32>
    %28 = vector.broadcast %27 : vector<1x6xf32> to vector<6x6xf32>
    %29 = arith.addf %26, %28 : vector<6x6xf32>
    %c0_22 = arith.constant 0 : index
    %c0_23 = arith.constant 0 : index
    %30 = vector.load %arg14[%c0_22, %c0_23] : memref<6x32xbf16, #tpu.memory_space<vmem>>, vector<6x32xbf16>
    %31 = arith.truncf %29 : vector<6x6xf32> to vector<6x6xbf16>
    %cst_24 = arith.constant dense<0.000000e+00> : vector<6x32xf32>
    %32 = tpu.matmul %31, %30, %cst_24 {dimension_numbers = #tpu.dot_dimension_numbers<[1], [0], [0], [1], [0, 0, 1, 1], [], []>} : vector<6x6xbf16>, vector<6x32xbf16>, vector<6x32xf32> -> vector<6x32xf32>
    %c0_25 = arith.constant 0 : index
    %c0_26 = arith.constant 0 : index
    %33 = vector.load %arg15[%c0_25, %c0_26] : memref<1x32xf32, #tpu.memory_space<vmem>>, vector<1x32xf32>
    %34 = vector.broadcast %33 : vector<1x32xf32> to vector<6x32xf32>
    %35 = arith.addf %32, %34 : vector<6x32xf32>
    %cst_27 = arith.constant 0.000000e+00 : f32
    %36 = vector.broadcast %cst_27 : f32 to vector<6x32xf32>
    %37 = arith.maximumf %35, %36 : vector<6x32xf32>
    %c0_28 = arith.constant 0 : index
    %c0_29 = arith.constant 0 : index
    %38 = vector.load %arg16[%c0_28, %c0_29] : memref<32x32xbf16, #tpu.memory_space<vmem>>, vector<32x32xbf16>
    %39 = arith.truncf %37 : vector<6x32xf32> to vector<6x32xbf16>
    %cst_30 = arith.constant dense<0.000000e+00> : vector<6x32xf32>
    %40 = tpu.matmul %39, %38, %cst_30 {dimension_numbers = #tpu.dot_dimension_numbers<[1], [0], [0], [1], [0, 0, 1, 1], [], []>} : vector<6x32xbf16>, vector<32x32xbf16>, vector<6x32xf32> -> vector<6x32xf32>
    %c0_31 = arith.constant 0 : index
    %c0_32 = arith.constant 0 : index
    %41 = vector.load %arg17[%c0_31, %c0_32] : memref<1x32xf32, #tpu.memory_space<vmem>>, vector<1x32xf32>
    %42 = vector.broadcast %41 : vector<1x32xf32> to vector<6x32xf32>
    %43 = arith.addf %40, %42 : vector<6x32xf32>
    %cst_33 = arith.constant 0.000000e+00 : f32
    %44 = vector.broadcast %cst_33 : f32 to vector<6x32xf32>
    %45 = arith.maximumf %43, %44 : vector<6x32xf32>
    %46 = arith.truncf %22 : vector<12x32xf32> to vector<12x32xbf16>
    %47 = arith.truncf %45 : vector<6x32xf32> to vector<6x32xbf16>
    %48 = tpu.iota {dimensions = array<i32: 0>} : vector<2x12xi32>
    %c0_34 = arith.constant 0 : index
    %c0_35 = arith.constant 0 : index
    %49 = vector.load %arg2[%c0_34, %c0_35] : memref<1x12xi32, #tpu.memory_space<vmem>>, vector<1x12xi32>
    %50 = vector.broadcast %49 : vector<1x12xi32> to vector<2x12xi32>
    %51 = arith.cmpi eq, %48, %50 : vector<2x12xi32>
    %cst_36 = arith.constant 1.000000e+00 : f32
    %cst_37 = arith.constant 0.000000e+00 : f32
    %52 = vector.broadcast %cst_36 : f32 to vector<2x12xf32>
    %53 = vector.broadcast %cst_37 : f32 to vector<2x12xf32>
    %54 = arith.select %51, %52, %53 : vector<2x12xi1>, vector<2x12xf32>
    %55 = tpu.iota {dimensions = array<i32: 0>} : vector<2x6xi32>
    %c0_38 = arith.constant 0 : index
    %c0_39 = arith.constant 0 : index
    %56 = vector.load %arg3[%c0_38, %c0_39] : memref<1x6xi32, #tpu.memory_space<vmem>>, vector<1x6xi32>
    %57 = vector.broadcast %56 : vector<1x6xi32> to vector<2x6xi32>
    %58 = arith.cmpi eq, %55, %57 : vector<2x6xi32>
    %cst_40 = arith.constant 1.000000e+00 : f32
    %cst_41 = arith.constant 0.000000e+00 : f32
    %59 = vector.broadcast %cst_40 : f32 to vector<2x6xf32>
    %60 = vector.broadcast %cst_41 : f32 to vector<2x6xf32>
    %61 = arith.select %58, %59, %60 : vector<2x6xi1>, vector<2x6xf32>
    %cst_42 = arith.constant dense<0.000000e+00> : vector<2xf32>
    %62 = vector.multi_reduction <add>, %54, %cst_42 [1] : vector<2x12xf32> to vector<2xf32>
    %63 = vector.shape_cast %62 : vector<2xf32> to vector<2x1xf32>
    %cst_43 = arith.constant 1.000000e+00 : f32
    %64 = vector.broadcast %cst_43 : f32 to vector<2x1xf32>
    %65 = arith.maximumf %63, %64 : vector<2x1xf32>
    %cst_44 = arith.constant 1.000000e+00 : f32
    %66 = vector.broadcast %cst_44 : f32 to vector<2x1xf32>
    %67 = arith.divf %66, %65 : vector<2x1xf32>
    %cst_45 = arith.constant dense<0.000000e+00> : vector<2xf32>
    %68 = vector.multi_reduction <add>, %61, %cst_45 [1] : vector<2x6xf32> to vector<2xf32>
    %69 = vector.shape_cast %68 : vector<2xf32> to vector<2x1xf32>
    %cst_46 = arith.constant 1.000000e+00 : f32
    %70 = vector.broadcast %cst_46 : f32 to vector<2x1xf32>
    %71 = arith.maximumf %69, %70 : vector<2x1xf32>
    %cst_47 = arith.constant 1.000000e+00 : f32
    %72 = vector.broadcast %cst_47 : f32 to vector<2x1xf32>
    %73 = arith.divf %72, %71 : vector<2x1xf32>
    %74 = arith.truncf %54 : vector<2x12xf32> to vector<2x12xbf16>
    %cst_48 = arith.constant dense<0.000000e+00> : vector<2x32xf32>
    %75 = tpu.matmul %74, %46, %cst_48 {dimension_numbers = #tpu.dot_dimension_numbers<[1], [0], [0], [1], [0, 0, 1, 1], [], []>} : vector<2x12xbf16>, vector<12x32xbf16>, vector<2x32xf32> -> vector<2x32xf32>
    %76 = vector.broadcast %67 : vector<2x1xf32> to vector<2x32xf32>
    %77 = arith.mulf %75, %76 : vector<2x32xf32>
    %78 = arith.truncf %61 : vector<2x6xf32> to vector<2x6xbf16>
    %cst_49 = arith.constant dense<0.000000e+00> : vector<2x32xf32>
    %79 = tpu.matmul %78, %47, %cst_49 {dimension_numbers = #tpu.dot_dimension_numbers<[1], [0], [0], [1], [0, 0, 1, 1], [], []>} : vector<2x6xbf16>, vector<6x32xbf16>, vector<2x32xf32> -> vector<2x32xf32>
    %80 = vector.broadcast %73 : vector<2x1xf32> to vector<2x32xf32>
    %81 = arith.mulf %79, %80 : vector<2x32xf32>
    %82 = tpu.concatenate %77, %81 in 1 : vector<2x32xf32>, vector<2x32xf32> -> vector<2x64xf32>
    %c0_50 = arith.constant 0 : index
    %c0_51 = arith.constant 0 : index
    %83 = vector.load %arg18[%c0_50, %c0_51] : memref<64x32xbf16, #tpu.memory_space<vmem>>, vector<64x32xbf16>
    %84 = arith.truncf %82 : vector<2x64xf32> to vector<2x64xbf16>
    %cst_52 = arith.constant dense<0.000000e+00> : vector<2x32xf32>
    %85 = tpu.matmul %84, %83, %cst_52 {dimension_numbers = #tpu.dot_dimension_numbers<[1], [0], [0], [1], [0, 0, 1, 1], [], []>} : vector<2x64xbf16>, vector<64x32xbf16>, vector<2x32xf32> -> vector<2x32xf32>
    %c0_53 = arith.constant 0 : index
    %c0_54 = arith.constant 0 : index
    %86 = vector.load %arg19[%c0_53, %c0_54] : memref<1x32xf32, #tpu.memory_space<vmem>>, vector<1x32xf32>
    %87 = vector.broadcast %86 : vector<1x32xf32> to vector<2x32xf32>
    %88 = arith.addf %85, %87 : vector<2x32xf32>
    %cst_55 = arith.constant 0.000000e+00 : f32
    %89 = vector.broadcast %cst_55 : f32 to vector<2x32xf32>
    %90 = arith.maximumf %88, %89 : vector<2x32xf32>
    %c0_56 = arith.constant 0 : index
    %c0_57 = arith.constant 0 : index
    %91 = vector.load %arg20[%c0_56, %c0_57] : memref<32x32xbf16, #tpu.memory_space<vmem>>, vector<32x32xbf16>
    %92 = arith.truncf %90 : vector<2x32xf32> to vector<2x32xbf16>
    %cst_58 = arith.constant dense<0.000000e+00> : vector<2x32xf32>
    %93 = tpu.matmul %92, %91, %cst_58 {dimension_numbers = #tpu.dot_dimension_numbers<[1], [0], [0], [1], [0, 0, 1, 1], [], []>} : vector<2x32xbf16>, vector<32x32xbf16>, vector<2x32xf32> -> vector<2x32xf32>
    %c0_59 = arith.constant 0 : index
    %c0_60 = arith.constant 0 : index
    %94 = vector.load %arg21[%c0_59, %c0_60] : memref<1x32xf32, #tpu.memory_space<vmem>>, vector<1x32xf32>
    %95 = vector.broadcast %94 : vector<1x32xf32> to vector<2x32xf32>
    %96 = arith.addf %93, %95 : vector<2x32xf32>
    %97 = tpu.transpose %54, [1, 0] : vector<2x12xf32> -> vector<12x2xf32>
    %98 = arith.truncf %97 : vector<12x2xf32> to vector<12x2xbf16>
    %99 = arith.truncf %96 : vector<2x32xf32> to vector<2x32xbf16>
    %cst_61 = arith.constant dense<0.000000e+00> : vector<12x32xf32>
    %100 = tpu.matmul %98, %99, %cst_61 {dimension_numbers = #tpu.dot_dimension_numbers<[1], [0], [0], [1], [0, 0, 1, 1], [], []>} : vector<12x2xbf16>, vector<2x32xbf16>, vector<12x32xf32> -> vector<12x32xf32>
    %101 = tpu.iota {dimensions = array<i32: 1>} : vector<12x6xi32>
    %c0_62 = arith.constant 0 : index
    %c0_63 = arith.constant 0 : index
    %102 = vector.load %arg4[%c0_62, %c0_63] : memref<12x1xi32, #tpu.memory_space<vmem>>, vector<12x1xi32>
    %103 = vector.broadcast %102 : vector<12x1xi32> to vector<12x6xi32>
    %104 = arith.cmpi eq, %101, %103 : vector<12x6xi32>
    %cst_64 = arith.constant 1.000000e+00 : f32
    %cst_65 = arith.constant 0.000000e+00 : f32
    %105 = vector.broadcast %cst_64 : f32 to vector<12x6xf32>
    %106 = vector.broadcast %cst_65 : f32 to vector<12x6xf32>
    %107 = arith.select %104, %105, %106 : vector<12x6xi1>, vector<12x6xf32>
    %108 = arith.truncf %107 : vector<12x6xf32> to vector<12x6xbf16>
    %cst_66 = arith.constant dense<0.000000e+00> : vector<12x32xf32>
    %109 = tpu.matmul %108, %47, %cst_66 {dimension_numbers = #tpu.dot_dimension_numbers<[1], [0], [0], [1], [0, 0, 1, 1], [], []>} : vector<12x6xbf16>, vector<6x32xbf16>, vector<12x32xf32> -> vector<12x32xf32>
    %110 = tpu.concatenate %22, %100, %109 in 1 : vector<12x32xf32>, vector<12x32xf32>, vector<12x32xf32> -> vector<12x96xf32>
    %c0_67 = arith.constant 0 : index
    %c0_68 = arith.constant 0 : index
    %111 = vector.load %arg22[%c0_67, %c0_68] : memref<96x32xbf16, #tpu.memory_space<vmem>>, vector<96x32xbf16>
    %112 = arith.truncf %110 : vector<12x96xf32> to vector<12x96xbf16>
    %cst_69 = arith.constant dense<0.000000e+00> : vector<12x32xf32>
    %113 = tpu.matmul %112, %111, %cst_69 {dimension_numbers = #tpu.dot_dimension_numbers<[1], [0], [0], [1], [0, 0, 1, 1], [], []>} : vector<12x96xbf16>, vector<96x32xbf16>, vector<12x32xf32> -> vector<12x32xf32>
    %c0_70 = arith.constant 0 : index
    %c0_71 = arith.constant 0 : index
    %114 = vector.load %arg23[%c0_70, %c0_71] : memref<1x32xf32, #tpu.memory_space<vmem>>, vector<1x32xf32>
    %115 = vector.broadcast %114 : vector<1x32xf32> to vector<12x32xf32>
    %116 = arith.addf %113, %115 : vector<12x32xf32>
    %cst_72 = arith.constant 0.000000e+00 : f32
    %117 = vector.broadcast %cst_72 : f32 to vector<12x32xf32>
    %118 = arith.maximumf %116, %117 : vector<12x32xf32>
    %c0_73 = arith.constant 0 : index
    %c0_74 = arith.constant 0 : index
    %119 = vector.load %arg24[%c0_73, %c0_74] : memref<32x32xbf16, #tpu.memory_space<vmem>>, vector<32x32xbf16>
    %120 = arith.truncf %118 : vector<12x32xf32> to vector<12x32xbf16>
    %cst_75 = arith.constant dense<0.000000e+00> : vector<12x32xf32>
    %121 = tpu.matmul %120, %119, %cst_75 {dimension_numbers = #tpu.dot_dimension_numbers<[1], [0], [0], [1], [0, 0, 1, 1], [], []>} : vector<12x32xbf16>, vector<32x32xbf16>, vector<12x32xf32> -> vector<12x32xf32>
    %c0_76 = arith.constant 0 : index
    %c0_77 = arith.constant 0 : index
    %122 = vector.load %arg25[%c0_76, %c0_77] : memref<1x32xf32, #tpu.memory_space<vmem>>, vector<1x32xf32>
    %123 = vector.broadcast %122 : vector<1x32xf32> to vector<12x32xf32>
    %124 = arith.addf %121, %123 : vector<12x32xf32>
    %125 = tpu.iota {dimensions = array<i32: 1>} : vector<5x12xi32>
    %c0_78 = arith.constant 0 : index
    %c0_79 = arith.constant 0 : index
    %126 = vector.load %arg5[%c0_78, %c0_79] : memref<5x1xi32, #tpu.memory_space<vmem>>, vector<5x1xi32>
    %127 = vector.broadcast %126 : vector<5x1xi32> to vector<5x12xi32>
    %128 = arith.cmpi eq, %125, %127 : vector<5x12xi32>
    %cst_80 = arith.constant 1.000000e+00 : f32
    %cst_81 = arith.constant 0.000000e+00 : f32
    %129 = vector.broadcast %cst_80 : f32 to vector<5x12xf32>
    %130 = vector.broadcast %cst_81 : f32 to vector<5x12xf32>
    %131 = arith.select %128, %129, %130 : vector<5x12xi1>, vector<5x12xf32>
    %132 = arith.truncf %131 : vector<5x12xf32> to vector<5x12xbf16>
    %133 = arith.truncf %124 : vector<12x32xf32> to vector<12x32xbf16>
    %cst_82 = arith.constant dense<0.000000e+00> : vector<5x32xf32>
    %134 = tpu.matmul %132, %133, %cst_82 {dimension_numbers = #tpu.dot_dimension_numbers<[1], [0], [0], [1], [0, 0, 1, 1], [], []>} : vector<5x12xbf16>, vector<12x32xbf16>, vector<5x32xf32> -> vector<5x32xf32>
    %c0_83 = arith.constant 0 : index
    %c0_84 = arith.constant 0 : index
    %135 = vector.load %arg26[%c0_83, %c0_84] : memref<32x32xbf16, #tpu.memory_space<vmem>>, vector<32x32xbf16>
    %136 = arith.truncf %134 : vector<5x32xf32> to vector<5x32xbf16>
    %cst_85 = arith.constant dense<0.000000e+00> : vector<5x32xf32>
    %137 = tpu.matmul %136, %135, %cst_85 {dimension_numbers = #tpu.dot_dimension_numbers<[1], [0], [0], [1], [0, 0, 1, 1], [], []>} : vector<5x32xbf16>, vector<32x32xbf16>, vector<5x32xf32> -> vector<5x32xf32>
    %c0_86 = arith.constant 0 : index
    %c0_87 = arith.constant 0 : index
    %138 = vector.load %arg27[%c0_86, %c0_87] : memref<1x32xf32, #tpu.memory_space<vmem>>, vector<1x32xf32>
    %139 = vector.broadcast %138 : vector<1x32xf32> to vector<5x32xf32>
    %140 = arith.addf %137, %139 : vector<5x32xf32>
    %cst_88 = arith.constant 0.000000e+00 : f32
    %141 = vector.broadcast %cst_88 : f32 to vector<5x32xf32>
    %142 = arith.maximumf %140, %141 : vector<5x32xf32>
    %c0_89 = arith.constant 0 : index
    %c0_90 = arith.constant 0 : index
    %143 = vector.load %arg28[%c0_89, %c0_90] : memref<32x1xbf16, #tpu.memory_space<vmem>>, vector<32x1xbf16>
    %144 = arith.truncf %142 : vector<5x32xf32> to vector<5x32xbf16>
    %cst_91 = arith.constant dense<0.000000e+00> : vector<5x1xf32>
    %145 = tpu.matmul %144, %143, %cst_91 {dimension_numbers = #tpu.dot_dimension_numbers<[1], [0], [0], [1], [0, 0, 1, 1], [], []>} : vector<5x32xbf16>, vector<32x1xbf16>, vector<5x1xf32> -> vector<5x1xf32>
    %c0_92 = arith.constant 0 : index
    %c0_93 = arith.constant 0 : index
    %146 = vector.load %arg29[%c0_92, %c0_93] : memref<1x1xf32, #tpu.memory_space<vmem>>, vector<1x1xf32>
    %147 = vector.broadcast %146 : vector<1x1xf32> to vector<5x1xf32>
    %148 = arith.addf %145, %147 : vector<5x1xf32>
    %c0_94 = arith.constant 0 : index
    %c0_95 = arith.constant 0 : index
    %149 = vector.load %arg30[%c0_94, %c0_95] : memref<5x1xf32, #tpu.memory_space<vmem>>, vector<5x1xf32>
    tpu.vector_store %arg30[%c0_94, %c0_95], %148 {strides = array<i32>} : memref<5x1xf32, #tpu.memory_space<vmem>>, vector<5x1xf32>,
    return
  }
}

</mosaic_0001>

<bundles_post_ra>
// kernel: flexible_jss_forward.1
= control target key start
LH: loop header
LB: loop body
LE: loop exit
PB: predicated region body
PF: predicated region fallthrough
CT: control target
= control target key end

     0   :  { %v1556_v0 = vmov 0.0   ;;  %s1557_s3 = smov 8   ;;  %vm1558_vm0 = vmmov 0   ;;  %s1559_s10 = smov 6   ;;  %vm162_vm1 = vcmask 1043456   ;;  %vm310_vm2 = vcmask 1042432   ;;  %s1807_s0 = inlined_call_operand.smem [shape: u32[31], index: -1, kind: input, shape index: {}] }
   0x1   :  { %1365 = vmatprep.subr.bf16.mxu0 %v1556_v0  ;;  %s1245_s6 = sld [smem:[%s1807_s0 + %s1557_s3]]   ;;  %1367 = vmatprep.mubr.msk.bf16.mxu0 %vm1558_vm0, %v1556_v0  ;;  %s1560_s14 = smov 7   ;;  %vm158_vm3 = vcmask 64512   ;;  %vm306_vm4 = vcmask 48128   ;;  %vm233_vm5 = vcmask 261120   ;;  %v425_v42 = vlaneseq }
   0x2   :  { %s1_s9 = sld [smem:[%s1807_s0]]   ;;  %1371 = vmatprep.subr.bf16.mxu1 %v1556_v0  ;;  %1375 = vmatprep.mubr.msk.bf16.mxu1 %vm1558_vm0, %v1556_v0  ;;  %s1561_s18 = smov 14   ;;  %vm448_vm7 = vcmask 41984   ;;  %vm441_vm8 = vcmask 91136   ;;  %vm460_vm10 = vcmask 1045504   ;;  %vm456_vm11 = vcmask 97280  }
   0x3   :  { %s1243_s13 = sld [smem:[%s1807_s0 + %s1559_s10]]   ;;  %s1562_s22 = smov 1   ;;  %v426_v43 = vshrl.u32 %v425_v42, 7  ;;  %vm598_vm12 = vcmask 523264   ;;  %vm748_vm15 = vcmask 1040384  }
   0x4   :  { %s1244_s17 = sld [smem:[%s1807_s0 + %s1560_s14]]   ;;  %s1563_s26 = smov 12  }
   0x5   :  { %s1251_s21 = sld [smem:[%s1807_s0 + %s1561_s18]]   ;;  %s1564_s30 = smov 13  }
   0x6   :  { %s1238_s25 = sld [smem:[%s1807_s0 + %s1562_s22]]   ;;  %s1565_s4 = smov 10  }
   0x7   :  { %v149_v1 = vld [vmem:[%s1245_s6] sm:$0xf]  ;;  %s1249_s29 = sld [smem:[%s1807_s0 + %s1563_s26]]   ;;  %s1566_s8 = smov 16  }
   0x8   :  { %v164_v2 = vsel %vm162_vm1, %v149_v1, 0  ;;  %v129_v3 = vld [vmem:[%s1_s9] sm:$0xff]  ;;  %v130_v4 = vld [vmem:[%s1_s9 + $0x8] sm:$0xf]  ;;  %s1250_s3 = sld [smem:[%s1807_s0 + %s1564_s30]]   ;;  %s1567_s12 = smov 9   ;;  %vm744_vm1 = vcmask 15360  }
   0x9   :  { %1366 = vmatpush3.bf16.msra.mxu0 %v164_v2  ;;  %v1268_v5 = vld [vmem:[%s1243_s13] ss:$0 sm:$0xff]  ;;  %s1247_s7 = sld [smem:[%s1807_s0 + %s1565_s4]]   ;;  %s1568_s16 = smov 15  }
   0xa   :  { %v138_v6 = vmul.f32 %v1268_v5, %v129_v3  ;;  %v139_v7 = vmul.f32 %v1268_v5, %v130_v4  ;;  %v1269_v8 = vld [vmem:[%s1244_s17] ss:$0 sm:$0xff]  ;;  %1379 = vmatprep.subr.bf16.mxu0 %v1556_v0  ;;  %s1253_s11 = sld [smem:[%s1807_s0 + %s1566_s8]]   ;;  %s1569_s20 = smov 3  }
   0xb   :  { %v297_v9 = vld [vmem:[%s1251_s21] sm:$0x7]  ;;  %s1246_s15 = sld [smem:[%s1807_s0 + %s1567_s12]]   ;;  %s1570_s24 = smov 2  }
   0xc   :  { %v147_v10 = vadd.f32 %v1269_v8, %v138_v6  ;;  %v148_v11 = vadd.f32 %v1269_v8, %v139_v7  ;;  %v280_v12 = vld [vmem:[%s1238_s25] sm:$0x3f]  ;;  %v312_v15 = vsel %vm310_vm2, %v297_v9, 0  ;;  %s1252_s19 = sld [smem:[%s1807_s0 + %s1568_s16]]   ;;  %s1571_s28 = smov 11   ;;  %v1573_v9 = vmov 0  }
   0xd   :  { %v1276_v13 = vld [vmem:[%s1249_s29] ss:$0 sm:$0xff]  ;;  %s1240_s23 = sld [smem:[%s1807_s0 + %s1569_s20]]   ;;  %s1572_s2 = smov 17   ;;  %1519 = vset.pattern.permute.xlu0 %v1573_v9  ;;  %1518 = vset.pattern.permute.xlu1 %v1573_v9 }
   0xe   :  { %v150_v14 = vpack.c.bf16 %v148_v11, %v147_v10  ;;  %v288_v16 = vmul.f32 %v1276_v13, %v280_v12  ;;  %v1277_v17 = vld [vmem:[%s1250_s3] ss:$0 sm:$0xff]  ;;  %s1239_s27 = sld [smem:[%s1807_s0 + %s1570_s24]]   ;;  %s1574_s6 = smov 4  }
   0xf   :  { %v1530_v20 = vld [vmem:[%s1247_s7 + $0x8] sm:$0xff]   ;;  %v1531_v21 = vld [vmem:[%s1247_s7] sm:$0xff]   ;;  %s1248_s1 = sld [smem:[%s1807_s0 + %s1571_s28]]   ;;  %s1575_s10 = smov 18  }
  0x10   :  { %1368 = vmatmul.mubr.msk.bf16.vlgmr.msra.gmra.mxu0 %vm158_vm3, %v150_v14  ;;  %v296_v18 = vadd.f32 %v1277_v17, %v288_v16  ;;  %1372 = vmatpush3.bf16.msra.mxu1 %v1530_v20  ;;  %v1532_v33 = vld [vmem:[%s1253_s11 + $0x8] sm:$0xff]   ;;  %v1533_v39 = vld [vmem:[%s1253_s11] sm:$0xff]   ;;  %s1254_s5 = sld [smem:[%s1807_s0 + %s1572_s2]]   ;;  %s1576_s14 = smov 32  }
  0x11   :  { %1380 = vmatpush3.bf16.msra.mxu0 %v312_v15  ;;  %1381 = vmatprep.mubr.msk.bf16.mxu0 %vm1558_vm0, %v1556_v0  ;;  %v1270_v22 = vld [vmem:[%s1246_s15] ss:$0 sm:$0xff]  ;;  %s1699_s9 = sld [smem:[%s1807_s0 + %s1574_s6]]   ;;  %s1577_s15 = smov 20  }
  0x12   :  { %1393 = vmatprep.subr.bf16.mxu0 %v1556_v0  ;;  %v298_v19 = vpack.c.bf16 %v296_v18, %v296_v18  ;;  %1373 = vmatprep.subr.bf16.mxu1 %v1556_v0  ;;  %v1278_v29 = vld [vmem:[%s1252_s19] ss:$0 sm:$0xff]  ;;  %s1255_s13 = sld [smem:[%s1807_s0 + %s1575_s10]]   ;;  %s1578_s19 = smov 19  }
  0x13   :  { %v1285_v44 = vld [vmem:[%s1240_s23] ss:$0 sm:$0xff]  ;;  %s1257_s18 = sld [smem:[%s1807_s0 + %s1577_s15]]   ;;  %s1579_s23 = smov 5  }
  0x14   :  { %1374 = vmatpush3.bf16.msra.mxu1 %v1531_v21  ;;  %vm439_vm6 = vcmp.eq.s32.totalorder %v426_v43, %v1285_v44  ;;  %v1284_v47 = vld [vmem:[%s1239_s27] ss:$0 sm:$0xff]  ;;  %s1256_s22 = sld [smem:[%s1807_s0 + %s1578_s19]]   ;;  %s1580_s27 = smov 64  }
  0x15   :  { %1385 = vmatprep.subr.bf16.mxu1 %v1556_v0  ;;  %v440_v45 = vsel %vm439_vm6, 1.0, %v1556_v0  ;;  %vm432_vm9 = vcmp.eq.s32.totalorder %v426_v43, %v1284_v47  ;;  %v1272_v50 = vld [vmem:[%s1248_s1] ss:$0 sm:$0xff]  ;;  %s1242_s26 = sld [smem:[%s1807_s0 + %s1579_s23]]   ;;  %s1581_s28 = smov 21  }
  0x16   :  { %v449_v46 = vsel %vm448_vm7, %v440_v45, 0.0  ;;  %v1665_v48 = vsel %vm432_vm9, 1.0, %v1556_v0  ;;  %v1280_v57 = vld [vmem:[%s1254_s5] ss:$0 sm:$0xff]  ;;  %v505_v8 = vpack.c.bf16 %v440_v45, %v440_v45  ;;  %s1258_s1 = sld [smem:[%s1807_s0 + %s1581_s28]]   ;;  %s1582_s2 = smov 22  }
  0x17   :  { %450 = vadd.xlane.f32.xlu0 %v449_v46  ;;  %v442_v49 = vsel %vm441_vm8, %v1665_v48, 0.0  ;;  %v455_v3 = vpack.c.bf16 %v1665_v48, %v1665_v48  ;;  %v796_v10 = vld [vmem:[%s1699_s9 + $0x8] sm:$0xf]  ;;  %s1259_s5 = sld [smem:[%s1807_s0 + %s1582_s2]]   ;;  %s1583_s6 = smov 24  }
  0x18   :  { %1382 = vmatmul.mubr.msk.bf16.vlgmr.msra.gmra.mxu0 %vm306_vm4, %v298_v19  ;;  %v1534_v11 = vld [vmem:[%s1255_s13 + $0x18] sm:$0xff]   ;;  %v1535_v12 = vld [vmem:[%s1255_s13 + $0x10] sm:$0xff]   ;;  %v1536_v13 = vld [vmem:[%s1255_s13 + $0x8] sm:$0xff]   ;;  %s1584_s10 = smov 23   ;;  %s1589_s30 = smov 27  }
  0x19   :  { %1395 = vmatprep.mubr.msk.bf16.mxu0 %vm1558_vm0, %v1556_v0  ;;  %v1537_v14 = vld [vmem:[%s1255_s13] sm:$0xff]   ;;  %s1260_s13 = sld [smem:[%s1807_s0 + %s1584_s10]]   ;;  %s1590_s4 = smov 30  }
  0x1a   :  { %v1288_v43 = vld [vmem:[%s1256_s22] ss:$0 sm:$0xff]  ;;  %s1587_s22 = smov 28   ;;  %s1264_s3 = sld [smem:[%s1807_s0 + %s1589_s30]]  }
  0x1b   :  { %443 = vadd.xlane.f32.xlu0 %v442_v49  ;;  %s1265_s25 = sld [smem:[%s1807_s0 + %s1587_s22]]  }
  0x1c   :  { %s1267_s7 = sld [smem:[%s1807_s0 + %s1590_s4]]  }
  0x1d   :  { %v1540_v9 = vld [vmem:[%s1259_s5 + $0x28] sm:$0xff]  }
  0x31   :  { %801 = vperm.xlu0 %1519, %v796_v10   ;;  %v1541_v10 = vld [vmem:[%s1259_s5 + $0x20] sm:$0xff]  }
  0xa0   :  { %v451_v15 = vpop.xlane.xlu0 %450 }
  0xa1   :  { %v452_v16 = vmax.f32 %v451_v15, 1.0 }
  0xa3   :  { %1552 = vrcp.f32 %v452_v16 }
  0xb0   :  { %v1553_v18 = vpop.eup %1552 }
  0xd0   :  { %v200_v23 = vpop.f32.mrf.mxu0 }
  0xd1   :  { %v201_v25 = vadd.f32 %v1270_v22, %v200_v23 }
  0xd2   :  { %v1369_v24 = vpop.f32.mrf.mxu0 }
  0xd3   :  { %v207_v30 = vmax.f32 %v201_v25, 0.0 }
  0xd4   :  { %v203_v26 = vpop.f32.mrf.mxu0 }
  0xd5   :  { %v204_v27 = vadd.f32 %v1270_v22, %v203_v26  ;;  %v795_v26 = vld [vmem:[%s1699_s9] sm:$0xff]  ;;  %s1261_s9 = sld [smem:[%s1807_s0 + %s1583_s6]]  }
  0xd6   :  { %v1370_v28 = vpop.f32.mrf.mxu0 }
  0xd7   :  { %v208_v31 = vmax.f32 %v204_v27, 0.0  ;;  %v444_v28 = vpop.xlane.xlu0 %443 }
  0xd8   :  { %v348_v32 = vpop.f32.mrf.mxu0 }
  0xd9   :  { %v213_v34 = vpack.c.bf16 %v208_v31, %v207_v30  ;;  %v349_v35 = vadd.f32 %v1278_v29, %v348_v32  ;;  %v445_v29 = vmax.f32 %v444_v28, 1.0 }
  0xda   :  { %v1383_v36 = vpop.f32.mrf.mxu0 }
  0xdb   :  { %v354_v37 = vmax.f32 %v349_v35, 0.0  ;;  %1376 = vmatmul.mubr.msk.bf16.vlgmr.msra.gmra.mxu1 %vm233_vm5, %v213_v34  ;;  %1554 = vrcp.f32 %v445_v29  ;;  %v1717_v35 = vand.u32 127, %v425_v42  ;;  %v802_v36 = vpop.permute.xlu0 %801  ;;  %v1539_v42 = vld [vmem:[%s1257_s18] sm:$0xff]  }
  0xdc   :  { %v351_v38 = vpop.f32.mrf.mxu0  ;;  %1386 = vmatpush3.bf16.msra.mxu1 %v1532_v33  ;;  %1389 = vmatprep.mubr.msk.bf16.mxu1 %vm1558_vm0, %v1556_v0 }
  0xdd   :  { %1387 = vmatprep.subr.bf16.mxu1 %v1556_v0  ;;  %v359_v41 = vpack.c.bf16 %v354_v37, %v354_v37  ;;  %vm804_vm13 = vcmp.eq.s32.totalorder %v1717_v35, %v802_v36 }
  0xde   :  { %v1384_v40 = vpop.f32.mrf.mxu0  ;;  %v806_v37 = vsel %vm804_vm13, 1.0, %v1556_v0 }
  0xe0   :  { %1388 = vmatpush3.bf16.msra.mxu1 %v1533_v39 }
  0xe1   :  { %1399 = vmatprep.subr.bf16.mxu1 %v1556_v0 }
  0xe3   :  { %1390 = vmatmul.mubr.msk.bf16.vlgmr.msra.gmra.mxu1 %vm233_vm5, %v359_v41  ;;  %v1538_v41 = vld [vmem:[%s1257_s18 + $0x8] sm:$0xff]   ;;  %s1586_s18 = smov 25  }
  0xe4   :  { %1401 = vmatprep.mubr.msk.bf16.mxu1 %vm1558_vm0, %v1556_v0  ;;  %s1262_s21 = sld [smem:[%s1807_s0 + %s1586_s18]]  }
  0xe8   :  { %v1555_v30 = vpop.eup %1554 }
 0x19b   :  { %v271_v51 = vpop.f32.mrf.mxu1 }
 0x19c   :  { %v1674_v53 = vadd.f32 %v1272_v50, %v271_v51 }
 0x19d   :  { %v1377_v52 = vpop.f32.mrf.mxu1 }
 0x19e   :  { %v278_v58 = vmax.f32 %v1674_v53, 0.0  ;;  %v1547_v53 = vld [vmem:[%s1261_s9] sm:$0xff]  }
 0x19f   :  { %v274_v54 = vpop.f32.mrf.mxu1 }
 0x1a0   :  { %v1676_v55 = vadd.f32 %v1272_v50, %v274_v54 }
 0x1a1   :  { %v1378_v56 = vpop.f32.mrf.mxu1 }
 0x1a2   :  { %v279_v59 = vmax.f32 %v1676_v55, 0.0  ;;  %v1546_v55 = vld [vmem:[%s1261_s9 + $0x8] sm:$0xff]  }
 0x1a3   :  { %v416_v60 = vpop.f32.mrf.mxu1 }
 0x1a4   :  { %v423_v61 = vpack.c.bf16 %v279_v59, %v278_v58  ;;  %v417_v62 = vadd.f32 %v1280_v57, %v416_v60  ;;  %v1043_v60 = vld [vmem:[%s1242_s26] sm:$0x1f]  ;;  %s1588_s26 = smov 29  }
 0x1a5   :  { %v1391_v63 = vpop.f32.mrf.mxu1  ;;  %s1266_s29 = sld [smem:[%s1807_s0 + %s1588_s26]]  }
 0x1a6   :  { %v422_v1 = vmax.f32 %v417_v62, 0.0  ;;  %v462_v2 = vsel %vm460_vm10, %v423_v61, 0  ;;  %v1294_v62 = vld [vmem:[%s1258_s1] ss:$0 sm:$0xff] }
 0x1a7   :  { %v419_v4 = vpop.f32.mrf.mxu1  ;;  %1394 = vmatpush3.bf16.msra.mxu0 %v462_v2 }
 0x1a8   :  { %v424_v5 = vpack.c.bf16 %v422_v1, %v422_v1  ;;  %1405 = vmatprep.subr.bf16.mxu0 %v1556_v0 }
 0x1a9   :  { %v1392_v6 = vpop.f32.mrf.mxu1 }
 0x1aa   :  { %v510_v7 = vsel %vm310_vm2, %v424_v5, 0  ;;  %1396 = vmatmul.mubr.msk.bf16.vlgmr.msra.gmra.mxu0 %vm456_vm11, %v455_v3  ;;  %vm928_vm2 = vcmask 785408  }
 0x1ab   :  { %1400 = vmatpush3.bf16.msra.mxu1 %v510_v7  ;;  %1413 = vmatprep.mubr.msk.bf16.mxu0 %vm1558_vm0, %v1556_v0 }
 0x1ac   :  { %1417 = vmatprep.subr.bf16.mxu1 %v1556_v0  ;;  %1406 = vmatpush3.bf16.msra.mxu0 %v1534_v11  ;;  %v1542_v11 = vld [vmem:[%s1259_s5 + $0x18] sm:$0xff]  }
 0x1ad   :  { %1407 = vmatprep.subr.bf16.mxu0 %v1556_v0 }
 0x1ae   :  { %1402 = vmatmul.mubr.msk.bf16.vlgmr.msra.gmra.mxu1 %vm306_vm4, %v505_v8 }
 0x1af   :  { %1421 = vmatprep.mubr.msk.bf16.mxu1 %vm1558_vm0, %v1556_v0  ;;  %1418 = vmatpush3.bf16.msra.mxu1 %v1538_v41 }
 0x1b0   :  { %1408 = vmatpush3.bf16.msra.mxu0 %v1535_v12  ;;  %1419 = vmatprep.subr.bf16.mxu1 %v1556_v0  ;;  %v1543_v12 = vld [vmem:[%s1259_s5 + $0x10] sm:$0xff]  }
 0x1b1   :  { %1409 = vmatprep.subr.bf16.mxu0 %v1556_v0 }
 0x1b3   :  { %1420 = vmatpush3.bf16.msra.mxu1 %v1539_v42  ;;  %v1308_v42 = vld [vmem:[%s1262_s21] ss:$0 sm:$0xff] }
 0x1b4   :  { %1410 = vmatpush3.bf16.msra.mxu0 %v1536_v13  ;;  %1425 = vmatprep.subr.bf16.mxu1 %v1556_v0  ;;  %v1544_v13 = vld [vmem:[%s1259_s5 + $0x8] sm:$0xff]  }
 0x1b5   :  { %1411 = vmatprep.subr.bf16.mxu0 %v1556_v0 }
 0x1b8   :  { %1412 = vmatpush3.bf16.msra.mxu0 %v1537_v14  ;;  %v1545_v14 = vld [vmem:[%s1259_s5] sm:$0xff]  }
 0x1b9   :  { %1431 = vmatprep.subr.bf16.mxu0 %v1556_v0 }
 0x26a   :  { %v498_v17 = vpop.f32.mrf.mxu0 }
 0x26b   :  { %v504_v31 = vmul.f32 %v1555_v30, %v498_v17 }
 0x26c   :  { %v1397_v19 = vpop.f32.mrf.mxu0 }
 0x26e   :  { %v546_v20 = vpop.f32.mrf.mxu1  ;;  %v501_v21 = vpop.f32.mrf.mxu0 }
 0x26f   :  { %v552_v22 = vmul.f32 %v1553_v18, %v546_v20 }
 0x270   :  { %v1403_v23 = vpop.f32.mrf.mxu1  ;;  %v1398_v24 = vpop.f32.mrf.mxu0 }
 0x271   :  { %554 = vrot.lane.b32.xlu1 %v552_v22, %s1576_s14 }
 0x272   :  { %v549_v25 = vpop.f32.mrf.mxu1 }
 0x274   :  { %v1404_v27 = vpop.f32.mrf.mxu1 }
 0x275   :  { %798 = vperm.xlu1 %1518, %v795_v26  }
 0x29e   :  { %710 = vxpose.xlu1.b32.start.end [1/1] (short) (narrow) %v1665_v48, 16 }
 0x2e3   :  { %v555_v32 = vpop.permute.xlu1 %554 }
 0x2e4   :  { %v557_v33 = vsel %vm233_vm5, %v504_v31, %v555_v32 }
 0x2e5   :  { %v566_v34 = vpack.c.bf16 %v557_v33, %v557_v33 }
 0x2e7   :  { %1414 = vmatmul.mubr.msk.bf16.vlgmr.msra.gmra.mxu0 %vm598_vm12, %v566_v34 }
 0x2e8   :  { %1432 = vmatpush3.bf16.msra.mxu0 %v510_v7  ;;  %1433 = vmatprep.mubr.msk.bf16.mxu0 %vm1558_vm0, %v1556_v0 }
 0x2e9   :  { %1453 = vmatprep.subr.bf16.mxu0 %v1556_v0 }
 0x2f0   :  { %v799_v38 = vpop.permute.xlu1 %798 }
 0x2f1   :  { %vm803_vm14 = vcmp.eq.s32.totalorder %v1717_v35, %v799_v38 }
 0x2f2   :  { %v805_v39 = vsel %vm803_vm14, 1.0, %v1556_v0 }
 0x2f3   :  { %v807_v40 = vpack.c.bf16 %v806_v37, %v805_v39 }
 0x2f5   :  { %1434 = vmatmul.mubr.msk.bf16.vlgmr.msra.gmra.mxu0 %vm306_vm4, %v807_v40 }
 0x2f6   :  { %1457 = vmatprep.mubr.msk.bf16.mxu0 %vm1558_vm0, %v1556_v0  ;;  %1454 = vmatpush3.bf16.msra.mxu0 %v1546_v55 }
 0x2f7   :  { %1455 = vmatprep.subr.bf16.mxu0 %v1556_v0 }
 0x2fa   :  { %1456 = vmatpush3.bf16.msra.mxu0 %v1547_v53 }
 0x2fb   :  { %1461 = vmatprep.subr.bf16.mxu0 %v1556_v0 }
 0x31a   :  { %v726_v61 = vpop.trf.xlu1 }
 0x31e   :  { %v727_v4 = vpop.trf.xlu1 }
 0x31f   :  { %v742_v8 = vpack.c.bf16 %v727_v4, %v726_v61 }
 0x3a7   :  { %v636_v44 = vpop.f32.mrf.mxu0 }
 0x3a8   :  { %v637_v45 = vadd.f32 %v1288_v43, %v636_v44 }
 0x3a9   :  { %v1415_v46 = vpop.f32.mrf.mxu0 }
 0x3aa   :  { %v642_v47 = vmax.f32 %v637_v45, 0.0 }
 0x3ab   :  { %v639_v48 = vpop.f32.mrf.mxu0 }
 0x3ac   :  { %v647_v49 = vpack.c.bf16 %v642_v47, %v642_v47 }
 0x3ad   :  { %v1416_v50 = vpop.f32.mrf.mxu0 }
 0x3ae   :  { %1422 = vmatmul.mubr.msk.bf16.vlgmr.msra.gmra.mxu1 %vm233_vm5, %v647_v49 }
 0x3af   :  { %1427 = vmatprep.mubr.msk.bf16.mxu1 %vm1558_vm0, %v1556_v0 }
 0x3b5   :  { %v845_v51 = vpop.f32.mrf.mxu0 }
 0x3b7   :  { %v1435_v52 = vpop.f32.mrf.mxu0 }
 0x3b9   :  { %v848_v54 = vpop.f32.mrf.mxu0 }
 0x3ba   :  { %v1525_v56 = vpack.i.bf16 %v848_v54, %v845_v51 }
 0x3bb   :  { %v1436_v57 = vpop.f32.mrf.mxu0 }
 0x3bc   :  { %1526 = vrot.lane.b32.xlu0 %v1525_v56, %s1580_s27 }
 0x3c0   :  { %1045 = vperm.xlu0 %1519, %v1043_v60  }
 0x42e   :  { %v1527_v21 = vpop.permute.xlu0 %1526 }
 0x42f   :  { %v1529_v24 = vunpack.i.h.bf16 %v1527_v21  ;;  %v1528_v25 = vunpack.i.l.bf16 %v1527_v21 }
 0x43b   :  { %v1046_v41 = vpop.permute.xlu0 %1045 }
 0x43c   :  { %vm1047_vm3 = vcmp.eq.s32.totalorder %v1717_v35, %v1046_v41 }
 0x43d   :  { %v1048_v49 = vsel %vm1047_vm3, 1.0, %v1556_v0 }
 0x43e   :  { %v1049_v52 = vpack.c.bf16 %v1048_v49, %v1048_v49 }
 0x46e   :  { %v704_v63 = vpop.f32.mrf.mxu1 }
 0x46f   :  { %v705_v1 = vadd.f32 %v1294_v62, %v704_v63  ;;  %v1550_v62 = vld [vmem:[%s1265_s25 + $0x8] sm:$0xff]   ;;  %v1551_v63 = vld [vmem:[%s1265_s25] sm:$0xff]  }
 0x470   :  { %v1423_v2 = vpop.f32.mrf.mxu1 }
 0x471   :  { %v743_v3 = vpack.c.bf16 %v705_v1, %v705_v1  ;;  %v66_v1 = vstv %s1266_s29  ;;  %v1313_v2 = vld [vmem:[%s1264_s3] ss:$0 sm:$0xff] }
 0x472   :  { %v707_v5 = vpop.f32.mrf.mxu1  ;;  %67 = vst [vmem:[#allocation2] sm:$0x1] %v66_v1 }
 0x473   :  { %v750_v6 = vsel %vm748_vm15, %v743_v3, 0 }
 0x474   :  { %v1424_v7 = vpop.f32.mrf.mxu1  ;;  %1426 = vmatpush3.bf16.msra.mxu1 %v750_v6 }
 0x475   :  { %1437 = vmatprep.subr.bf16.mxu1 %v1556_v0 }
 0x477   :  { %1428 = vmatmul.mubr.msk.bf16.vlgmr.msra.gmra.mxu1 %vm744_vm1, %v742_v8 }
 0x478   :  { %1449 = vmatprep.mubr.msk.bf16.mxu1 %vm1558_vm0, %v1556_v0  ;;  %1438 = vmatpush3.bf16.msra.mxu1 %v1540_v9 }
 0x479   :  { %1439 = vmatprep.subr.bf16.mxu1 %v1556_v0  ;;  %v1317_v9 = vld [vmem:[#allocation2] ss:$0 sm:$0xff] }
 0x47c   :  { %1440 = vmatpush3.bf16.msra.mxu1 %v1541_v10 }
 0x47d   :  { %1441 = vmatprep.subr.bf16.mxu1 %v1556_v0 }
 0x480   :  { %1442 = vmatpush3.bf16.msra.mxu1 %v1542_v11 }
 0x481   :  { %1443 = vmatprep.subr.bf16.mxu1 %v1556_v0 }
 0x484   :  { %1444 = vmatpush3.bf16.msra.mxu1 %v1543_v12 }
 0x485   :  { %1445 = vmatprep.subr.bf16.mxu1 %v1556_v0 }
 0x488   :  { %1446 = vmatpush3.bf16.msra.mxu1 %v1544_v13 }
 0x489   :  { %1447 = vmatprep.subr.bf16.mxu1 %v1556_v0 }
 0x48c   :  { %1448 = vmatpush3.bf16.msra.mxu1 %v1545_v14 }
 0x48d   :  { %1475 = vmatprep.subr.bf16.mxu1 %v1556_v0 }
 0x537   :  { %v786_v15 = vpop.f32.mrf.mxu1 }
 0x539   :  { %v1429_v16 = vpop.f32.mrf.mxu1 }
 0x53b   :  { %v789_v17 = vpop.f32.mrf.mxu1 }
 0x53c   :  { %v1520_v18 = vpack.i.bf16 %v789_v17, %v786_v15 }
 0x53d   :  { %v1430_v19 = vpop.f32.mrf.mxu1 }
 0x53e   :  { %1521 = vrot.lane.b32.xlu1 %v1520_v18, %s1576_s14  ;;  %s1585_s14 = smov 26  }
 0x53f   :  { %s1263_s17 = sld [smem:[%s1807_s0 + %s1585_s14]]  }
 0x545   :  { %v1548_v51 = vld [vmem:[%s1263_s17 + $0x8] sm:$0xff]   ;;  %v1549_v35 = vld [vmem:[%s1263_s17] sm:$0xff]  }
 0x5b0   :  { %v1522_v20 = vpop.permute.xlu1 %1521 }
 0x5b1   :  { %v1524_v22 = vunpack.i.h.bf16 %v1522_v20  ;;  %v1523_v23 = vunpack.i.l.bf16 %v1522_v20 }
 0x5b3   :  { %v869_v26 = vsel %vm233_vm5, %v279_v59, %v1524_v22  ;;  %v868_v27 = vsel %vm233_vm5, %v278_v58, %v1523_v23  ;;  %v1300_v58 = vld [vmem:[%s1260_s13] ss:$0 sm:$0xff] }
 0x5b4   :  { %v870_v28 = vsel %vm598_vm12, %v868_v27, %v1528_v25  ;;  %v871_v29 = vsel %vm598_vm12, %v869_v26, %v1529_v24 }
 0x5b5   :  { %v884_v30 = vpack.c.bf16 %v871_v29, %v870_v28 }
 0x5b7   :  { %1450 = vmatmul.mubr.msk.bf16.vlgmr.msra.gmra.mxu1 %vm928_vm2, %v884_v30 }
 0x5b8   :  { %1479 = vmatprep.mubr.msk.bf16.mxu1 %vm1558_vm0, %v1556_v0  ;;  %1476 = vmatpush3.bf16.msra.mxu1 %v1550_v62 }
 0x5b9   :  { %1477 = vmatprep.subr.bf16.mxu1 %v1556_v0 }
 0x5bc   :  { %1478 = vmatpush3.bf16.msra.mxu1 %v1551_v63 }
 0x677   :  { %v966_v59 = vpop.f32.mrf.mxu1 }
 0x678   :  { %v967_v32 = vadd.f32 %v1300_v58, %v966_v59 }
 0x679   :  { %v1451_v31 = vpop.f32.mrf.mxu1 }
 0x67a   :  { %v973_v37 = vmax.f32 %v967_v32, 0.0 }
 0x67b   :  { %v969_v33 = vpop.f32.mrf.mxu1 }
 0x67c   :  { %v970_v34 = vadd.f32 %v1300_v58, %v969_v33 }
 0x67d   :  { %v1452_v36 = vpop.f32.mrf.mxu1 }
 0x67e   :  { %v974_v38 = vmax.f32 %v970_v34, 0.0 }
 0x680   :  { %v979_v39 = vpack.c.bf16 %v974_v38, %v973_v37 }
 0x682   :  { %1458 = vmatmul.mubr.msk.bf16.vlgmr.msra.gmra.mxu0 %vm233_vm5, %v979_v39 }
 0x683   :  { %1463 = vmatprep.mubr.msk.bf16.mxu0 %vm1558_vm0, %v1556_v0 }
 0x742   :  { %v1036_v40 = vpop.f32.mrf.mxu0 }
 0x743   :  { %v1037_v45 = vadd.f32 %v1308_v42, %v1036_v40 }
 0x744   :  { %v1459_v43 = vpop.f32.mrf.mxu0 }
 0x746   :  { %v1039_v44 = vpop.f32.mrf.mxu0 }
 0x747   :  { %v1040_v46 = vadd.f32 %v1308_v42, %v1039_v44 }
 0x748   :  { %v1460_v47 = vpop.f32.mrf.mxu0 }
 0x749   :  { %v1050_v48 = vpack.c.bf16 %v1040_v46, %v1037_v45 }
 0x74b   :  { %v1055_v50 = vsel %vm460_vm10, %v1050_v48, 0 }
 0x74c   :  { %1462 = vmatpush3.bf16.msra.mxu0 %v1055_v50 }
 0x74d   :  { %1467 = vmatprep.subr.bf16.mxu0 %v1556_v0 }
 0x74f   :  { %1464 = vmatmul.mubr.msk.bf16.vlgmr.msra.gmra.mxu0 %vm456_vm11, %v1049_v52 }
 0x750   :  { %1468 = vmatpush3.bf16.msra.mxu0 %v1548_v51  ;;  %1471 = vmatprep.mubr.msk.bf16.mxu0 %vm1558_vm0, %v1556_v0  ;;  %vm1232_vm0 = vcmask 4096  }
 0x751   :  { %1469 = vmatprep.subr.bf16.mxu0 %v1556_v0 }
 0x754   :  { %1470 = vmatpush3.bf16.msra.mxu0 %v1549_v35 }
 0x80f   :  { %v1091_v54 = vpop.f32.mrf.mxu0 }
 0x810   :  { %v1101_v56 = vpack.c.bf16 %v1091_v54, %v1091_v54 }
 0x811   :  { %v1465_v57 = vpop.f32.mrf.mxu0 }
 0x812   :  { %1472 = vmatmul.mubr.msk.bf16.vlgmr.msra.gmra.mxu0 %vm233_vm5, %v1101_v56 }
 0x813   :  { %v1094_v60 = vpop.f32.mrf.mxu0 }
 0x815   :  { %v1466_v61 = vpop.f32.mrf.mxu0 }
 0x8d2   :  { %v1158_v3 = vpop.f32.mrf.mxu0 }
 0x8d3   :  { %v1159_v4 = vadd.f32 %v1313_v2, %v1158_v3 }
 0x8d4   :  { %v1473_v5 = vpop.f32.mrf.mxu0 }
 0x8d5   :  { %v1164_v6 = vmax.f32 %v1159_v4, 0.0 }
 0x8d6   :  { %v1161_v0 = vpop.f32.mrf.mxu0 }
 0x8d7   :  { %v1169_v7 = vpack.c.bf16 %v1164_v6, %v1164_v6 }
 0x8d8   :  { %v1474_v8 = vpop.f32.mrf.mxu0 }
 0x8d9   :  { %1480 = vmatmul.mubr.msk.bf16.vlgmr.msra.gmra.mxu1 %vm233_vm5, %v1169_v7 }
 0x999   :  { %v1226_v10 = vpop.f32.mrf.mxu1 }
 0x99a   :  { %v1227_v11 = vadd.f32 %v1317_v9, %v1226_v10 }
 0x99b   :  { %v1481_v12 = vpop.f32.mrf.mxu1 }
 0x99c   :  { %1233 = vst.msk [vmem:[%s1267_s7] sm:$0x1f] %vm1232_vm0, %v1227_v11 }
 0x99d   :  { %v1229_v13 = vpop.f32.mrf.mxu1 }
 0x99f   :  { %v1482_v14 = vpop.f32.mrf.mxu1 }

</bundles_post_ra>
